<compile_context>
chip_gen: v5e
topology: v5e:2x2
jax: 0.10.0
libtpu: 0.0.40
codegen_flags: <defaults>
</compile_context>

<pallas_src>
import jax
import jax.numpy as jnp
from jax.experimental import pallas as pl
from jax.experimental.pallas import tpu as pltpu


def generate_planes():
    """EG3D-style triplane axes buffer, shape (3, 3, 3), float32."""
    return jnp.array(
        [
            [[1.0, 0.0, 0.0], [0.0, 1.0, 0.0], [0.0, 0.0, 1.0]],
            [[1.0, 0.0, 0.0], [0.0, 0.0, 1.0], [0.0, 1.0, 0.0]],
            [[0.0, 0.0, 1.0], [1.0, 0.0, 0.0], [0.0, 1.0, 0.0]],
        ],
        dtype=jnp.float32,
    )


def broadcast_planes(planes, batch_size, *, max_tile_bytes=4 * 1024 * 1024):
    """Pallas DMA kernel: repeat (S, C, H, W) -> (B, S, C, H, W)."""
    S, C, H, W = planes.shape
    dtype = planes.dtype
    itemsize = planes.dtype.itemsize
    total = S * C * H * W

    # Lane-dense flat view: make the trailing dim a multiple of 128 if we can.
    wd = W
    for cand in (1024, 512, 256, 128):
        if total % cand == 0:
            wd = cand
            break
    # TODO(synk): if total is not a multiple of 128 we fall back to the raw W
    # trailing dim; still correct, just lane-padded in the VMEM staging buffer.
    rows_total = total // wd

    # Rows per tile: largest divisor of rows_total whose tile fits the budget,
    # preferring multiples of 8 (sublane-aligned VMEM staging).
    max_rows = max(1, max_tile_bytes // (wd * itemsize))
    divisors = [
        r for r in range(1, min(rows_total, max_rows) + 1) if rows_total % r == 0
    ]
    mult8 = [r for r in divisors if r % 8 == 0]
    tile_rows = max(mult8) if mult8 else max(divisors)
    num_tiles = rows_total // tile_rows

    # Free (contiguous, row-major) reshape of the parameter.
    p_flat = planes.reshape(num_tiles, tile_rows, wd)

    def kernel(p_hbm, o_hbm, stage, in_sems, out_sems):
        # p_hbm : (T, R, wd)      HBM (pl.ANY)
        # o_hbm : (B, T, R, wd)   HBM (pl.ANY)
        # stage : (2, R, wd)      VMEM double-buffered staging
        t = pl.program_id(0)
        nt = pl.num_programs(0)
        slot = t % 2

        # Prime the read pipeline on the first grid step.
        @pl.when(t == 0)
        def _():
            pltpu.make_async_copy(p_hbm.at[0], stage.at[0], in_sems.at[0]).start()

        # Wait for the current tile to land in its staging slot.
        pltpu.make_async_copy(p_hbm.at[t], stage.at[slot], in_sems.at[slot]).wait()

        # Prefetch the next tile into the other slot; overlaps the writes below.
        @pl.when(t + 1 < nt)
        def _():
            pltpu.make_async_copy(
                p_hbm.at[t + 1], stage.at[1 - slot], in_sems.at[1 - slot]
            ).start()

        # Fan the tile out to every batch element, two writes in flight.
        for b in range(batch_size):
            oslot = b % 2
            if b >= 2:
                pltpu.make_async_copy(
                    stage.at[slot], o_hbm.at[b - 2, t], out_sems.at[oslot]
                ).wait()
            pltpu.make_async_copy(
                stage.at[slot], o_hbm.at[b, t], out_sems.at[oslot]
            ).start()
        # Drain the writes of this tile before the staging slot is reused.
        for b in range(max(0, batch_size - 2), batch_size):
            pltpu.make_async_copy(
                stage.at[slot], o_hbm.at[b, t], out_sems.at[b % 2]
            ).wait()

    out_flat = pl.pallas_call(
        kernel,
        out_shape=jax.ShapeDtypeStruct(
            (batch_size, num_tiles, tile_rows, wd), dtype
        ),
        grid_spec=pltpu.PrefetchScalarGridSpec(
            num_scalar_prefetch=0,
            grid=(num_tiles,),
            in_specs=[pl.BlockSpec(memory_space=pl.ANY)],
            out_specs=pl.BlockSpec(memory_space=pl.ANY),
            scratch_shapes=[
                pltpu.VMEM((2, tile_rows, wd), dtype),
                pltpu.SemaphoreType.DMA((2,)),  # input staging sems
                pltpu.SemaphoreType.DMA((2,)),  # output write sems
            ],
        ),
        compiler_params=pltpu.CompilerParams(
            # Tile axis carries cross-step DMA state (prefetch), so keep it
            # sequential.  The kernel is HBM-bandwidth bound; megacore would
            # not add bandwidth anyway.
            dimension_semantics=("arbitrary",),
            vmem_limit_bytes=32 * 1024 * 1024,
        ),
        cost_estimate=pl.CostEstimate(
            flops=0,
            transcendentals=0,
            bytes_accessed=(1 + batch_size) * total * itemsize,
        ),
    )(p_flat)

    # Free reshape back to the module's (B, S, C, H, W) layout.
    return out_flat.reshape(batch_size, S, C, H, W)


class PlaneEncoderPallas:
    """JAX/Pallas port of PlaneEncoder with arch='fixed_plane'."""

    def __init__(self, num_planes=3, f_dim=32, image_size=256, box_warp=1,
                 arch="fixed_plane", key=None):
        assert num_planes == 3, "only support triplane for now"
        assert arch == "fixed_plane", "only fixed_plane arch implemented"
        # TODO(synk): deconv_plane / enc_dec_plane / unet_plane arches require
        # full UNet encoder/decoder stacks and are out of scope for this kernel.
        self.arch = arch
        self.num_planes = num_planes
        self.f_dim = f_dim
        self.box_warp = box_warp
        if key is None:
            key = jax.random.PRNGKey(0)
        # th.randn(num_planes, f_dim, image_size, image_size) equivalent.
        self.planes = jax.random.normal(
            key, (num_planes, f_dim, image_size, image_size), dtype=jnp.float32
        )
        self.plane_axes = generate_planes()

    def __call__(self, x, timesteps, **unused):
        batch_size = x.shape[0]
        planes = broadcast_planes(self.planes, batch_size)
        return (self.plane_axes, self.box_warp, planes)


if __name__ == "__main__":
    key = jax.random.PRNGKey(0)
    k_param, k_x, k_t = jax.random.split(key, 3)

    # Small shapes consistent with the module.
    batch = 2
    in_channels = 4
    image_size = 16
    f_dim = 32
    num_planes = 3

    enc = PlaneEncoderPallas(
        num_planes=num_planes, f_dim=f_dim, image_size=image_size,
        box_warp=1, arch="fixed_plane", key=k_param,
    )

    x = jax.random.normal(k_x, (batch, in_channels, image_size, image_size),
                          dtype=jnp.float32)  # NCHW, unused by fixed_plane
    timesteps = jax.random.randint(k_t, (batch,), 0, 1000)  # unused

    plane_axes, box_warp, planes = enc(x, timesteps)
    planes = jax.block_until_ready(planes)

    # Correctness check against the pure-JAX reference broadcast (bit exact).
    ref = jnp.broadcast_to(
        enc.planes[None], (batch, num_planes, f_dim, image_size, image_size)
    )
    assert planes.shape == (batch, num_planes, f_dim, image_size, image_size)
    assert planes.dtype == jnp.float32
    assert plane_axes.shape == (3, 3, 3)
    assert box_warp == 1
    assert bool(jnp.array_equal(planes, ref))

    print("KERNEL_OK")
</pallas_src>

<mosaic_0001>
module attributes {stable_mosaic.version = 11 : i64} {
  func.func @kernel(%arg0: i32, %arg1: memref<1x24x1024xf32, #tpu.memory_space<any>>, %arg2: memref<2x1x24x1024xf32, #tpu.memory_space<any>>, %arg3: memref<2x24x1024xf32, #tpu.memory_space<vmem>>, %arg4: memref<2x!tpu.dma_semaphore, #tpu.memory_space<semaphore_mem>>, %arg5: memref<2x!tpu.dma_semaphore, #tpu.memory_space<semaphore_mem>>) attributes {dimension_semantics = [#tpu.dimension_semantics<arbitrary>], iteration_bounds = array<i64: 1>, scalar_prefetch = 0 : i64, scratch_operands = 3 : i64, tpu.core_type = #tpu.core_type<tc>, window_params = [{}, {}]} {
    %c2_i32 = arith.constant 2 : i32
    %c0_i32 = arith.constant 0 : i32
    %0 = arith.cmpi eq, %c2_i32, %c0_i32 : i32
    %c1_i32 = arith.constant 1 : i32
    %1 = arith.select %0, %c1_i32, %c2_i32 : i32
    %2 = arith.remsi %arg0, %1 : i32
    %c0_i32_0 = arith.constant 0 : i32
    %3 = arith.cmpi ne, %2, %c0_i32_0 : i32
    %c0_i32_1 = arith.constant 0 : i32
    %4 = arith.cmpi slt, %2, %c0_i32_1 : i32
    %c0_i32_2 = arith.constant 0 : i32
    %5 = arith.cmpi slt, %1, %c0_i32_2 : i32
    %6 = arith.xori %4, %5 : i1
    %7 = arith.andi %6, %3 : i1
    %8 = arith.addi %2, %1 : i32
    %9 = arith.select %7, %8, %2 : i32
    %c0_i32_3 = arith.constant 0 : i32
    %10 = arith.cmpi eq, %arg0, %c0_i32_3 : i32
    %11 = arith.extui %10 : i1 to i32
    %c0_i32_4 = arith.constant 0 : i32
    %12 = arith.cmpi ne, %11, %c0_i32_4 : i32
    scf.if %12 {
      %c0_i32_36 = arith.constant 0 : i32
      %c0_i32_37 = arith.constant 0 : i32
      %c0_i32_38 = arith.constant 0 : i32
      %c0_i32_39 = arith.constant 0 : i32
      %c0_i32_40 = arith.constant 0 : i32
      %47 = tpu.memref_slice %arg1[%c0_i32_36, %c0_i32_39, %c0_i32_40] : memref<1x24x1024xf32, #tpu.memory_space<any>> -> memref<1x24x1024xf32, #tpu.memory_space<any>>
      %48 = tpu.memref_squeeze %47 : memref<1x24x1024xf32, #tpu.memory_space<any>> -> memref<24x1024xf32, #tpu.memory_space<any>>
      %c0_i32_41 = arith.constant 0 : i32
      %c0_i32_42 = arith.constant 0 : i32
      %49 = tpu.memref_slice %arg3[%c0_i32_37, %c0_i32_41, %c0_i32_42] : memref<2x24x1024xf32, #tpu.memory_space<vmem>> -> memref<1x24x1024xf32, #tpu.memory_space<vmem>>
      %50 = tpu.memref_squeeze %49 : memref<1x24x1024xf32, #tpu.memory_space<vmem>> -> memref<24x1024xf32, #tpu.memory_space<vmem>>
      %51 = tpu.memref_slice %arg4[%c0_i32_38] : memref<2x!tpu.dma_semaphore, #tpu.memory_space<semaphore_mem>> -> memref<1x!tpu.dma_semaphore, #tpu.memory_space<semaphore_mem>>
      %52 = tpu.memref_squeeze %51 : memref<1x!tpu.dma_semaphore, #tpu.memory_space<semaphore_mem>> -> memref<!tpu.dma_semaphore, #tpu.memory_space<semaphore_mem>>
      tpu.enqueue_dma source(%48 : memref<24x1024xf32, #tpu.memory_space<any>>) target(%50 : memref<24x1024xf32, #tpu.memory_space<vmem>>) target_semaphore(%52 : memref<!tpu.dma_semaphore, #tpu.memory_space<semaphore_mem>>)
    } else {
    }
    %c0_i32_5 = arith.constant 0 : i32
    %c0_i32_6 = arith.constant 0 : i32
    %13 = tpu.memref_slice %arg1[%arg0, %c0_i32_5, %c0_i32_6] : memref<1x24x1024xf32, #tpu.memory_space<any>> -> memref<1x24x1024xf32, #tpu.memory_space<any>>
    %14 = tpu.memref_squeeze %13 : memref<1x24x1024xf32, #tpu.memory_space<any>> -> memref<24x1024xf32, #tpu.memory_space<any>>
    %c0_i32_7 = arith.constant 0 : i32
    %c0_i32_8 = arith.constant 0 : i32
    %15 = tpu.memref_slice %arg3[%9, %c0_i32_7, %c0_i32_8] : memref<2x24x1024xf32, #tpu.memory_space<vmem>> -> memref<1x24x1024xf32, #tpu.memory_space<vmem>>
    %16 = tpu.memref_squeeze %15 : memref<1x24x1024xf32, #tpu.memory_space<vmem>> -> memref<24x1024xf32, #tpu.memory_space<vmem>>
    %17 = tpu.memref_slice %arg4[%9] : memref<2x!tpu.dma_semaphore, #tpu.memory_space<semaphore_mem>> -> memref<1x!tpu.dma_semaphore, #tpu.memory_space<semaphore_mem>>
    %18 = tpu.memref_squeeze %17 : memref<1x!tpu.dma_semaphore, #tpu.memory_space<semaphore_mem>> -> memref<!tpu.dma_semaphore, #tpu.memory_space<semaphore_mem>>
    tpu.wait_dma2 semaphore(%18 : memref<!tpu.dma_semaphore, #tpu.memory_space<semaphore_mem>>) src(%14 : memref<24x1024xf32, #tpu.memory_space<any>>) dst(%16 : memref<24x1024xf32, #tpu.memory_space<vmem>>)
    %c1_i32_9 = arith.constant 1 : i32
    %19 = arith.addi %arg0, %c1_i32_9 : i32
    %c1_i32_10 = arith.constant 1 : i32
    %20 = arith.cmpi slt, %19, %c1_i32_10 : i32
    %21 = arith.extui %20 : i1 to i32
    %c0_i32_11 = arith.constant 0 : i32
    %22 = arith.cmpi ne, %21, %c0_i32_11 : i32
    scf.if %22 {
      %c1_i32_36 = arith.constant 1 : i32
      %47 = arith.addi %arg0, %c1_i32_36 : i32
      %c1_i32_37 = arith.constant 1 : i32
      %48 = arith.subi %c1_i32_37, %9 : i32
      %c1_i32_38 = arith.constant 1 : i32
      %49 = arith.subi %c1_i32_38, %9 : i32
      %c0_i32_39 = arith.constant 0 : i32
      %c0_i32_40 = arith.constant 0 : i32
      %50 = tpu.memref_slice %arg1[%47, %c0_i32_39, %c0_i32_40] : memref<1x24x1024xf32, #tpu.memory_space<any>> -> memref<1x24x1024xf32, #tpu.memory_space<any>>
      %51 = tpu.memref_squeeze %50 : memref<1x24x1024xf32, #tpu.memory_space<any>> -> memref<24x1024xf32, #tpu.memory_space<any>>
      %c0_i32_41 = arith.constant 0 : i32
      %c0_i32_42 = arith.constant 0 : i32
      %52 = tpu.memref_slice %arg3[%48, %c0_i32_41, %c0_i32_42] : memref<2x24x1024xf32, #tpu.memory_space<vmem>> -> memref<1x24x1024xf32, #tpu.memory_space<vmem>>
      %53 = tpu.memref_squeeze %52 : memref<1x24x1024xf32, #tpu.memory_space<vmem>> -> memref<24x1024xf32, #tpu.memory_space<vmem>>
      %54 = tpu.memref_slice %arg4[%49] : memref<2x!tpu.dma_semaphore, #tpu.memory_space<semaphore_mem>> -> memref<1x!tpu.dma_semaphore, #tpu.memory_space<semaphore_mem>>
      %55 = tpu.memref_squeeze %54 : memref<1x!tpu.dma_semaphore, #tpu.memory_space<semaphore_mem>> -> memref<!tpu.dma_semaphore, #tpu.memory_space<semaphore_mem>>
      tpu.enqueue_dma source(%51 : memref<24x1024xf32, #tpu.memory_space<any>>) target(%53 : memref<24x1024xf32, #tpu.memory_space<vmem>>) target_semaphore(%55 : memref<!tpu.dma_semaphore, #tpu.memory_space<semaphore_mem>>)
    } else {
    }
    %c0_i32_12 = arith.constant 0 : i32
    %c0_i32_13 = arith.constant 0 : i32
    %c0_i32_14 = arith.constant 0 : i32
    %c0_i32_15 = arith.constant 0 : i32
    %23 = tpu.memref_slice %arg3[%9, %c0_i32_14, %c0_i32_15] : memref<2x24x1024xf32, #tpu.memory_space<vmem>> -> memref<1x24x1024xf32, #tpu.memory_space<vmem>>
    %24 = tpu.memref_squeeze %23 : memref<1x24x1024xf32, #tpu.memory_space<vmem>> -> memref<24x1024xf32, #tpu.memory_space<vmem>>
    %c0_i32_16 = arith.constant 0 : i32
    %c0_i32_17 = arith.constant 0 : i32
    %25 = tpu.memref_slice %arg2[%c0_i32_12, %arg0, %c0_i32_16, %c0_i32_17] : memref<2x1x24x1024xf32, #tpu.memory_space<any>> -> memref<1x1x24x1024xf32, #tpu.memory_space<any>>
    %26 = tpu.memref_squeeze %25 : memref<1x1x24x1024xf32, #tpu.memory_space<any>> -> memref<24x1024xf32, #tpu.memory_space<any>>
    %27 = tpu.memref_slice %arg5[%c0_i32_13] : memref<2x!tpu.dma_semaphore, #tpu.memory_space<semaphore_mem>> -> memref<1x!tpu.dma_semaphore, #tpu.memory_space<semaphore_mem>>
    %28 = tpu.memref_squeeze %27 : memref<1x!tpu.dma_semaphore, #tpu.memory_space<semaphore_mem>> -> memref<!tpu.dma_semaphore, #tpu.memory_space<semaphore_mem>>
    tpu.enqueue_dma source(%24 : memref<24x1024xf32, #tpu.memory_space<vmem>>) target(%26 : memref<24x1024xf32, #tpu.memory_space<any>>) target_semaphore(%28 : memref<!tpu.dma_semaphore, #tpu.memory_space<semaphore_mem>>)
    %c1_i32_18 = arith.constant 1 : i32
    %c1_i32_19 = arith.constant 1 : i32
    %c0_i32_20 = arith.constant 0 : i32
    %c0_i32_21 = arith.constant 0 : i32
    %29 = tpu.memref_slice %arg3[%9, %c0_i32_20, %c0_i32_21] : memref<2x24x1024xf32, #tpu.memory_space<vmem>> -> memref<1x24x1024xf32, #tpu.memory_space<vmem>>
    %30 = tpu.memref_squeeze %29 : memref<1x24x1024xf32, #tpu.memory_space<vmem>> -> memref<24x1024xf32, #tpu.memory_space<vmem>>
    %c0_i32_22 = arith.constant 0 : i32
    %c0_i32_23 = arith.constant 0 : i32
    %31 = tpu.memref_slice %arg2[%c1_i32_18, %arg0, %c0_i32_22, %c0_i32_23] : memref<2x1x24x1024xf32, #tpu.memory_space<any>> -> memref<1x1x24x1024xf32, #tpu.memory_space<any>>
    %32 = tpu.memref_squeeze %31 : memref<1x1x24x1024xf32, #tpu.memory_space<any>> -> memref<24x1024xf32, #tpu.memory_space<any>>
    %33 = tpu.memref_slice %arg5[%c1_i32_19] : memref<2x!tpu.dma_semaphore, #tpu.memory_space<semaphore_mem>> -> memref<1x!tpu.dma_semaphore, #tpu.memory_space<semaphore_mem>>
    %34 = tpu.memref_squeeze %33 : memref<1x!tpu.dma_semaphore, #tpu.memory_space<semaphore_mem>> -> memref<!tpu.dma_semaphore, #tpu.memory_space<semaphore_mem>>
    tpu.enqueue_dma source(%30 : memref<24x1024xf32, #tpu.memory_space<vmem>>) target(%32 : memref<24x1024xf32, #tpu.memory_space<any>>) target_semaphore(%34 : memref<!tpu.dma_semaphore, #tpu.memory_space<semaphore_mem>>)
    %c0_i32_24 = arith.constant 0 : i32
    %c0_i32_25 = arith.constant 0 : i32
    %c0_i32_26 = arith.constant 0 : i32
    %c0_i32_27 = arith.constant 0 : i32
    %35 = tpu.memref_slice %arg3[%9, %c0_i32_26, %c0_i32_27] : memref<2x24x1024xf32, #tpu.memory_space<vmem>> -> memref<1x24x1024xf32, #tpu.memory_space<vmem>>
    %36 = tpu.memref_squeeze %35 : memref<1x24x1024xf32, #tpu.memory_space<vmem>> -> memref<24x1024xf32, #tpu.memory_space<vmem>>
    %c0_i32_28 = arith.constant 0 : i32
    %c0_i32_29 = arith.constant 0 : i32
    %37 = tpu.memref_slice %arg2[%c0_i32_24, %arg0, %c0_i32_28, %c0_i32_29] : memref<2x1x24x1024xf32, #tpu.memory_space<any>> -> memref<1x1x24x1024xf32, #tpu.memory_space<any>>
    %38 = tpu.memref_squeeze %37 : memref<1x1x24x1024xf32, #tpu.memory_space<any>> -> memref<24x1024xf32, #tpu.memory_space<any>>
    %39 = tpu.memref_slice %arg5[%c0_i32_25] : memref<2x!tpu.dma_semaphore, #tpu.memory_space<semaphore_mem>> -> memref<1x!tpu.dma_semaphore, #tpu.memory_space<semaphore_mem>>
    %40 = tpu.memref_squeeze %39 : memref<1x!tpu.dma_semaphore, #tpu.memory_space<semaphore_mem>> -> memref<!tpu.dma_semaphore, #tpu.memory_space<semaphore_mem>>
    tpu.wait_dma2 semaphore(%40 : memref<!tpu.dma_semaphore, #tpu.memory_space<semaphore_mem>>) src(%36 : memref<24x1024xf32, #tpu.memory_space<vmem>>) dst(%38 : memref<24x1024xf32, #tpu.memory_space<any>>)
    %c1_i32_30 = arith.constant 1 : i32
    %c1_i32_31 = arith.constant 1 : i32
    %c0_i32_32 = arith.constant 0 : i32
    %c0_i32_33 = arith.constant 0 : i32
    %41 = tpu.memref_slice %arg3[%9, %c0_i32_32, %c0_i32_33] : memref<2x24x1024xf32, #tpu.memory_space<vmem>> -> memref<1x24x1024xf32, #tpu.memory_space<vmem>>
    %42 = tpu.memref_squeeze %41 : memref<1x24x1024xf32, #tpu.memory_space<vmem>> -> memref<24x1024xf32, #tpu.memory_space<vmem>>
    %c0_i32_34 = arith.constant 0 : i32
    %c0_i32_35 = arith.constant 0 : i32
    %43 = tpu.memref_slice %arg2[%c1_i32_30, %arg0, %c0_i32_34, %c0_i32_35] : memref<2x1x24x1024xf32, #tpu.memory_space<any>> -> memref<1x1x24x1024xf32, #tpu.memory_space<any>>
    %44 = tpu.memref_squeeze %43 : memref<1x1x24x1024xf32, #tpu.memory_space<any>> -> memref<24x1024xf32, #tpu.memory_space<any>>
    %45 = tpu.memref_slice %arg5[%c1_i32_31] : memref<2x!tpu.dma_semaphore, #tpu.memory_space<semaphore_mem>> -> memref<1x!tpu.dma_semaphore, #tpu.memory_space<semaphore_mem>>
    %46 = tpu.memref_squeeze %45 : memref<1x!tpu.dma_semaphore, #tpu.memory_space<semaphore_mem>> -> memref<!tpu.dma_semaphore, #tpu.memory_space<semaphore_mem>>
    tpu.wait_dma2 semaphore(%46 : memref<!tpu.dma_semaphore, #tpu.memory_space<semaphore_mem>>) src(%42 : memref<24x1024xf32, #tpu.memory_space<vmem>>) dst(%44 : memref<24x1024xf32, #tpu.memory_space<any>>)
    return
  }
}

</mosaic_0001>

<bundles_post_ra>
// kernel: tpu_custom_call.1
= control target key start
LH: loop header
LB: loop body
LE: loop exit
PB: predicated region body
PF: predicated region fallthrough
CT: control target
= control target key end

     0   :  { %s219_s9 = smov [#allocation2]   ;;  %s239_s0 = inlined_call_operand.hbm [shape: f32[1,24,1024], index: 0, kind: input, shape index: {}]   ;;  %s240_s1 = inlined_call_operand.hbm [shape: f32[2,1,24,1024], index: 1, kind: output, shape index: {}]  }
   0x1   :  { %s25_s8 = sshll.u32 %s239_s0, 4  ;;  %s27_s10 = sshll.u32 %s219_s9, 4  ;;  %s26_s8 = int_to_ptr.hbm [resolvable:$true] %s25_s8  ;;  %s28_s10 = int_to_ptr.vmem [resolvable:$true] %s27_s10 }
   0x2   :  { %30 = dma.hbm_to_vmem [thread:$0]  %s26_s8, 3072, %s28_s10, [#allocation3] }
   0x3   :  { %213 = dma.done.wait [#allocation3], 3072 }
   0x4   :  { %214 = vsyncadd [#allocation3], 4294964224  ;;  %s77_s13 = sshll.u32 %s240_s1, 4  ;;  %s135_s16 = scalar_lea.hbm %s240_s1, 192  ;;  %s78_s13 = int_to_ptr.hbm [resolvable:$true] %s77_s13 }
   0x5   :  { %s94_s17 = sshll.u32 %s135_s16, 4  ;;  %s95_s17 = int_to_ptr.hbm [resolvable:$true] %s94_s17 }
   0x6   :  { %80 = dma.vmem_to_hbm [thread:$0]  %s28_s10, 3072, %s78_s13, [#allocation4] }
   0x7   :  { %97 = dma.vmem_to_hbm [thread:$0]  %s28_s10, 3072, %s95_s17, [#allocation4 + $0x1] }
   0x8   :  { %215 = dma.done.wait [#allocation4], 3072 }
   0x9   :  { %216 = vsyncadd [#allocation4], 4294964224 }
   0xa   :  { %217 = dma.done.wait [#allocation4 + $0x1], 3072 }
   0xb   :  { %218 = vsyncadd [#allocation4 + $0x1], 4294964224 }
   0xc   :  { %102 = vsyncmov [#allocation3] }
   0xf   :  { %s103_s0 = vpop.sfrf %102 }
  0x10   :  { %p136_p0 = scmp.ne.s32.totalorder %s103_s0, 0 }
  0x12   :  { %107 = shalt.err (%p136_p0)  }
  0x13   :  { %109 = vsyncmov [#allocation3 + $0x1] }
  0x16   :  { %s110_s18 = vpop.sfrf %109 }
  0x17   :  { %p137_p1 = scmp.ne.s32.totalorder %s110_s18, 0 }
  0x19   :  { %114 = shalt.err (%p137_p1)  }
  0x1a   :  { %115 = vsyncmov [#allocation4] }
  0x1d   :  { %s116_s19 = vpop.sfrf %115 }
  0x1e   :  { %p138_p2 = scmp.ne.s32.totalorder %s116_s19, 0 }
  0x20   :  { %120 = shalt.err (%p138_p2)  }
  0x21   :  { %122 = vsyncmov [#allocation4 + $0x1] }
  0x24   :  { %s123_s1 = vpop.sfrf %122 }
  0x25   :  { %p139_p3 = scmp.ne.s32.totalorder %s123_s1, 0 }
  0x27   :  { %127 = shalt.err (%p139_p3)  }

</bundles_post_ra>
